<compile_context>
chip_gen: v7x
topology: tpu7x:2x2x1
jax: 0.10.0
libtpu: 0.0.40
codegen_flags: <defaults>
</compile_context>

<pallas_src>
import math

import numpy as np
import jax
import jax.numpy as jnp
from jax.experimental import pallas as pl
from jax.experimental.pallas import tpu as pltpu

# ---------------------------------------------------------------------------
# Fixed irreps configuration
# ---------------------------------------------------------------------------
MUL1 = 4                          # multiplicity of the 1o input
DIM1 = MUL1 * 3                   # 12  = irreps_in1.dim
DIM2 = 1 + 3                      # 4   = irreps_in2.dim (1x0e + 1x1o)
MUL_OUT2 = 8                      # multiplicity of the 1e output
DIMO = MUL1 * 3 + MUL_OUT2 * 3    # 36  = irreps_out.dim
WEIGHT_NUMEL = MUL1 * 1 + MUL1 * 1 * MUL_OUT2   # 4 + 32 = 36

# normalization coefficients (irrep_normalization='component',
# path_normalization='element', all variances = 1, path_weight = 1):
#   ins1 (uvu, i_out=0): alpha = 3 / (num_elements = mul_in2 = 1)    -> sqrt(3)
#   ins2 (uvw, i_out=1): alpha = 3 / (num_elements = mul1*mul2 = 4)  -> sqrt(3/4)
C1 = math.sqrt(3.0)
C2 = math.sqrt(3.0 / 4.0)

# Wigner 3j symbols in the e3nn real basis (only l <= 1 needed here)
_W3J_101 = np.eye(3, dtype=np.float32).reshape(3, 1, 3) / np.sqrt(3.0)   # (1,0,1)
_eps = np.zeros((3, 3, 3), dtype=np.float32)
for (i, j, k), s in [((0, 1, 2), 1.0), ((1, 2, 0), 1.0), ((2, 0, 1), 1.0),
                     ((0, 2, 1), -1.0), ((2, 1, 0), -1.0), ((1, 0, 2), -1.0)]:
    _eps[i, j, k] = s
_W3J_111 = _eps / np.sqrt(6.0)                                            # (1,1,1)

W3J_101 = jnp.asarray(_W3J_101)
W3J_111 = jnp.asarray(_W3J_111)

# in-kernel column chunk (lanes); 128-aligned so loads/stores stay unmasked
CHUNK = 512


def _round_up(n, m):
    return ((n + m - 1) // m) * m


# ---------------------------------------------------------------------------
# Parameter setup (glue): fold path weights + Wigner-3j + normalization into a
# per-j bilinear tensor W[j, o, i] of shape (DIM2, DIMO, DIM1) so that
#   out.T = sum_j W[j] @ (x.T * y.T[j])        (batch on the lane axis)
# Built and kept in f32 even when activations are bf16 (precision of the fused
# constants is decided here, before the MXU ever sees them).
# ---------------------------------------------------------------------------
def build_fused_weight(weight):
    weight = weight.astype(jnp.float32)
    w1 = weight[0:MUL1].reshape(MUL1, 1)                         # uvu path (u, v=1)
    w2 = weight[MUL1:WEIGHT_NUMEL].reshape(MUL1, 1, MUL_OUT2)    # uvw path (u, v=1, w)

    # --- instruction 1: 'uvu', 1o (in1) x 0e (in2) -> 1o (out block 0) ---
    # out[z, 3u+k] += C1 * w1[u,0] * w3j101[i,0,k] * x[z, 3u+i] * y[z, 0]
    T1 = C1 * jnp.einsum('u,iak->uiak', w1[:, 0], W3J_101)        # (4, 3, 1, 3)
    W1 = jnp.einsum('uiak,uw->uiawk', T1, jnp.eye(MUL1, dtype=jnp.float32))
    W1 = W1.reshape(DIM1, 1, MUL1 * 3)                            # (12, 1, 12)

    # --- instruction 2: 'uvw', 1o (in1) x 1o (in2) -> 1e (out block 1) ---
    # out[z, 12 + 3w+k] += C2 * w2[u,0,w] * w3j111[i,j,k] * x[z,3u+i] * y[z,1+j]
    T2 = C2 * jnp.einsum('uw,ijk->uijwk', w2[:, 0, :], W3J_111)   # (4, 3, 3, 8, 3)
    W2 = T2.reshape(DIM1, 3, MUL_OUT2 * 3)                        # (12, 3, 24)

    Wbig = jnp.zeros((DIM1, DIM2, DIMO), dtype=jnp.float32)       # (i, j, o)
    Wbig = Wbig.at[:, 0:1, 0:MUL1 * 3].set(W1)
    Wbig = Wbig.at[:, 1:4, MUL1 * 3:DIMO].set(W2)
    return jnp.transpose(Wbig, (1, 2, 0))                         # (j, o, i) = (4, 36, 12)


# ---------------------------------------------------------------------------
# Pallas kernel: batch on the lane axis.  One grid step owns a (features, tb)
# slab; inside, a bounded loop walks 512-lane column chunks so the accumulator
# never exceeds ~20 vregs no matter how large tb is.
# ---------------------------------------------------------------------------
def tp_kernel(x_ref, y_ref, w_ref, o_ref):
    # x_ref: (DIM1, tb)   y_ref: (DIM2, tb)
    # w_ref: (DIM2, DIMO, DIM1) f32   o_ref: (DIMO, tb)
    n_chunks = x_ref.shape[1] // CHUNK

    @pl.loop(0, n_chunks)
    def _(c):
        col = pl.multiple_of(c * CHUNK, CHUNK)
        x = x_ref[:, pl.ds(col, CHUNK)].astype(jnp.float32)   # (12, 512)
        y = y_ref[:, pl.ds(col, CHUNK)].astype(jnp.float32)   # (4, 512)
        # j = 0 initializes the accumulator (no zeros + extra VPU add).
        acc = jnp.dot(w_ref[0], x * y[0:1, :],                # MXU: (36,12)@(12,512)
                      preferred_element_type=jnp.float32)
        for j in range(1, DIM2):                              # 3 more, unrolled at trace
            acc = acc + jnp.dot(w_ref[j], x * y[j:j + 1, :],
                                preferred_element_type=jnp.float32)
        o_ref[:, pl.ds(col, CHUNK)] = acc.astype(o_ref.dtype)


def _choose_tb(B, tb_max, min_steps=2):
    """Lane tile: as large as possible (amortize ~0.35us/step) but keep >=
    min_steps grid steps so both v7x TensorCores get work; CHUNK-aligned."""
    tb = -(-B // min_steps)                       # cdiv
    tb = _round_up(max(tb, CHUNK), CHUNK)
    return min(tb, _round_up(tb_max, CHUNK))


def tensor_product_feature_major(xT, yT, w_fused, *, tb_max=8192):
    """Fast path: feature-major activations, no boundary transposes.

    xT: (DIM1, B), yT: (DIM2, B)  ->  (DIMO, B).  B need not be tile-aligned:
    Pallas masks the ragged last block on writeback (the map is column-local,
    so garbage in the padded read region cannot reach valid columns).
    """
    B = xT.shape[1]
    tb = _choose_tb(B, tb_max)
    grid = (pl.cdiv(B, tb),)
    return pl.pallas_call(
        tp_kernel,
        out_shape=jax.ShapeDtypeStruct((DIMO, B), xT.dtype),
        grid_spec=pltpu.PrefetchScalarGridSpec(
            num_scalar_prefetch=0,
            grid=grid,
            in_specs=[
                pl.BlockSpec((DIM1, tb), lambda b: (0, b)),
                pl.BlockSpec((DIM2, tb), lambda b: (0, b)),
                # constant block index -> Pallas DMAs the ~7 KB weight once
                pl.BlockSpec((DIM2, DIMO, DIM1), lambda b: (0, 0, 0)),
            ],
            out_specs=pl.BlockSpec((DIMO, tb), lambda b: (0, b)),
        ),
        compiler_params=pltpu.CompilerParams(
            dimension_semantics=("parallel",)),      # megacore: shard batch tiles
    )(xT, yT, w_fused)


def tensor_product(x, y, w_fused, *, tb_max=8192):
    """Torch-convention entry point: x (B, 12), y (B, 4) -> out (B, 36)."""
    assert x.shape[-1] == DIM1 and y.shape[-1] == DIM2
    # TODO(synk): a real NequIP model should keep activations feature-major and
    # call tensor_product_feature_major directly; these boundary transposes are
    # full HBM round trips that roughly triple traffic for this mem-bound op.
    xT = jnp.transpose(x)
    yT = jnp.transpose(y)
    outT = tensor_product_feature_major(xT, yT, w_fused, tb_max=tb_max)
    return jnp.transpose(outT)                       # (B, DIMO)


# ---------------------------------------------------------------------------
# Pure-JAX reference mirroring the torch fx-generated forward (w3j einsum path)
# ---------------------------------------------------------------------------
def tp_reference(x, y, weight):
    B = x.shape[0]
    x1 = x.reshape(B, MUL1, 3)                       # 4x1o
    x2_0 = y[:, 0:1].reshape(B, 1, 1)                # 1x0e
    x2_1 = y[:, 1:4].reshape(B, 1, 3)                # 1x1o
    w1 = weight[0:MUL1].reshape(MUL1, 1)
    w2 = weight[MUL1:WEIGHT_NUMEL].reshape(MUL1, 1, MUL_OUT2)

    xx1 = jnp.einsum('zui,zvj->zuvij', x1, x2_0)
    r1 = C1 * jnp.einsum('uv,ijk,zuvij->zuk', w1, W3J_101, xx1)      # (B, 4, 3)

    xx2 = jnp.einsum('zui,zvj->zuvij', x1, x2_1)
    r2 = C2 * jnp.einsum('uvw,ijk,zuvij->zwk', w2, W3J_111, xx2)     # (B, 8, 3)

    return jnp.concatenate([r1.reshape(B, MUL1 * 3),
                            r2.reshape(B, MUL_OUT2 * 3)], axis=1)


# ---------------------------------------------------------------------------
if __name__ == "__main__":
    key = jax.random.PRNGKey(0)
    kx, ky, kw = jax.random.split(key, 3)

    # B deliberately not tile- or 128-aligned: exercises the ragged last block.
    # With B=3000: tb=1536, grid=2 steps, 3x 512-lane chunks per step.
    B = 3000
    x = jax.random.normal(kx, (B, DIM1), dtype=jnp.float32)
    y = jax.random.normal(ky, (B, DIM2), dtype=jnp.float32)
    # internal shared weight parameter, analogue of torch.randn(weight_numel)
    weight = jax.random.normal(kw, (WEIGHT_NUMEL,), dtype=jnp.float32)

    w_fused = build_fused_weight(weight)
    ref = tp_reference(x, y, weight)

    # 1) f32, torch-convention (batch-major) path
    out = jax.block_until_ready(tensor_product(x, y, w_fused))
    assert out.shape == (B, DIMO), out.shape
    assert jnp.allclose(out, ref, atol=1e-5, rtol=1e-5), \
        float(jnp.max(jnp.abs(out - ref)))

    # 2) f32, feature-major fast path, tiny ragged batch (single partial block)
    Bs = 70
    outT = jax.block_until_ready(
        tensor_product_feature_major(jnp.transpose(x[:Bs]),
                                     jnp.transpose(y[:Bs]), w_fused))
    assert outT.shape == (DIMO, Bs), outT.shape
    assert jnp.allclose(jnp.transpose(outT), ref[:Bs], atol=1e-5, rtol=1e-5), \
        float(jnp.max(jnp.abs(jnp.transpose(outT) - ref[:Bs])))

    # 3) bf16 activations/output (HBM-bound -> ~2x fewer bytes); fused weight
    #    stays f32 and accumulation stays f32 inside the kernel.
    out_bf16 = jax.block_until_ready(
        tensor_product(x.astype(jnp.bfloat16), y.astype(jnp.bfloat16), w_fused))
    assert out_bf16.dtype == jnp.bfloat16
    assert jnp.allclose(out_bf16.astype(jnp.float32), ref, atol=0.3, rtol=0.1), \
        float(jnp.max(jnp.abs(out_bf16.astype(jnp.float32) - ref)))

    print("KERNEL_OK")
</pallas_src>

<mosaic_0001>
module attributes {stable_mosaic.version = 11 : i64} {
  func.func @tp_kernel(%arg0: i32, %arg1: memref<12x1536xf32, #tpu.memory_space<vmem>>, %arg2: memref<4x1536xf32, #tpu.memory_space<vmem>>, %arg3: memref<4x36x12xf32, #tpu.memory_space<vmem>>, %arg4: memref<36x1536xf32, #tpu.memory_space<vmem>>) attributes {dimension_semantics = [#tpu.dimension_semantics<parallel>], iteration_bounds = array<i64: 2>, scalar_prefetch = 0 : i64, scratch_operands = 0 : i64, tpu.core_type = #tpu.core_type<tc>, window_params = [{transform_indices = @transform_0, window_bounds = array<i64: 12, 1536>}, {transform_indices = @transform_1, window_bounds = array<i64: 4, 1536>}, {pipeline_mode = #tpu.pipeline_mode<synchronous>, transform_indices = @transform_2, window_bounds = array<i64: 4, 36, 12>}, {transform_indices = @transform_3, window_bounds = array<i64: 36, 1536>}]} {
    %c0_i32 = arith.constant 0 : i32
    %c3_i32 = arith.constant 3 : i32
    %0 = arith.addi %c0_i32, %c3_i32 : i32
    %c1_i32 = arith.constant 1 : i32
    scf.for %arg5 = %c0_i32 to %0 step %c1_i32  : i32 {
      %c1_i32_1 = arith.constant 1 : i32
      %1 = arith.muli %arg5, %c1_i32_1 : i32
      %c0_i32_2 = arith.constant 0 : i32
      %2 = arith.addi %c0_i32_2, %1 : i32
      %c512_i32 = arith.constant 512 : i32
      %3 = arith.muli %2, %c512_i32 : i32
      %4 = tpu.assume_multiple %3, 512 : i32
      %c0 = arith.constant 0 : index
      %5 = arith.index_cast %4 : i32 to index
      %6 = vector.load %arg1[%c0, %5] : memref<12x1536xf32, #tpu.memory_space<vmem>>, vector<12x512xf32>
      %c0_3 = arith.constant 0 : index
      %7 = arith.index_cast %4 : i32 to index
      %8 = vector.load %arg2[%c0_3, %7] : memref<4x1536xf32, #tpu.memory_space<vmem>>, vector<4x512xf32>
      %c0_4 = arith.constant 0 : index
      %c0_5 = arith.constant 0 : index
      %c0_6 = arith.constant 0 : index
      %9 = vector.load %arg3[%c0_4, %c0_5, %c0_6] : memref<4x36x12xf32, #tpu.memory_space<vmem>>, vector<1x36x12xf32>
      %10 = vector.shape_cast %9 : vector<1x36x12xf32> to vector<36x12xf32>
      %11 = vector.extract_strided_slice %8 {offsets = [0, 0], sizes = [1, 512], strides = [1, 1]} : vector<4x512xf32> to vector<1x512xf32>
      %12 = vector.broadcast %11 : vector<1x512xf32> to vector<12x512xf32>
      %13 = arith.mulf %6, %12 : vector<12x512xf32>
      %cst = arith.constant dense<0.000000e+00> : vector<36x512xf32>
      %14 = tpu.matmul %10, %13, %cst {dimension_numbers = #tpu.dot_dimension_numbers<[1], [0], [0], [1], [0, 0, 1, 1], [], []>} : vector<36x12xf32>, vector<12x512xf32>, vector<36x512xf32> -> vector<36x512xf32>
      %c1 = arith.constant 1 : index
      %c0_7 = arith.constant 0 : index
      %c0_8 = arith.constant 0 : index
      %15 = vector.load %arg3[%c1, %c0_7, %c0_8] : memref<4x36x12xf32, #tpu.memory_space<vmem>>, vector<1x36x12xf32>
      %16 = vector.shape_cast %15 : vector<1x36x12xf32> to vector<36x12xf32>
      %17 = vector.extract_strided_slice %8 {offsets = [1, 0], sizes = [1, 512], strides = [1, 1]} : vector<4x512xf32> to vector<1x512xf32>
      %18 = vector.broadcast %17 : vector<1x512xf32> to vector<12x512xf32>
      %19 = arith.mulf %6, %18 : vector<12x512xf32>
      %cst_9 = arith.constant dense<0.000000e+00> : vector<36x512xf32>
      %20 = tpu.matmul %16, %19, %cst_9 {dimension_numbers = #tpu.dot_dimension_numbers<[1], [0], [0], [1], [0, 0, 1, 1], [], []>} : vector<36x12xf32>, vector<12x512xf32>, vector<36x512xf32> -> vector<36x512xf32>
      %21 = arith.addf %14, %20 : vector<36x512xf32>
      %c2 = arith.constant 2 : index
      %c0_10 = arith.constant 0 : index
      %c0_11 = arith.constant 0 : index
      %22 = vector.load %arg3[%c2, %c0_10, %c0_11] : memref<4x36x12xf32, #tpu.memory_space<vmem>>, vector<1x36x12xf32>
      %23 = vector.shape_cast %22 : vector<1x36x12xf32> to vector<36x12xf32>
      %24 = vector.extract_strided_slice %8 {offsets = [2, 0], sizes = [1, 512], strides = [1, 1]} : vector<4x512xf32> to vector<1x512xf32>
      %25 = vector.broadcast %24 : vector<1x512xf32> to vector<12x512xf32>
      %26 = arith.mulf %6, %25 : vector<12x512xf32>
      %cst_12 = arith.constant dense<0.000000e+00> : vector<36x512xf32>
      %27 = tpu.matmul %23, %26, %cst_12 {dimension_numbers = #tpu.dot_dimension_numbers<[1], [0], [0], [1], [0, 0, 1, 1], [], []>} : vector<36x12xf32>, vector<12x512xf32>, vector<36x512xf32> -> vector<36x512xf32>
      %28 = arith.addf %21, %27 : vector<36x512xf32>
      %c3 = arith.constant 3 : index
      %c0_13 = arith.constant 0 : index
      %c0_14 = arith.constant 0 : index
      %29 = vector.load %arg3[%c3, %c0_13, %c0_14] : memref<4x36x12xf32, #tpu.memory_space<vmem>>, vector<1x36x12xf32>
      %30 = vector.shape_cast %29 : vector<1x36x12xf32> to vector<36x12xf32>
      %31 = vector.extract_strided_slice %8 {offsets = [3, 0], sizes = [1, 512], strides = [1, 1]} : vector<4x512xf32> to vector<1x512xf32>
      %32 = vector.broadcast %31 : vector<1x512xf32> to vector<12x512xf32>
      %33 = arith.mulf %6, %32 : vector<12x512xf32>
      %cst_15 = arith.constant dense<0.000000e+00> : vector<36x512xf32>
      %34 = tpu.matmul %30, %33, %cst_15 {dimension_numbers = #tpu.dot_dimension_numbers<[1], [0], [0], [1], [0, 0, 1, 1], [], []>} : vector<36x12xf32>, vector<12x512xf32>, vector<36x512xf32> -> vector<36x512xf32>
      %35 = arith.addf %28, %34 : vector<36x512xf32>
      %c0_16 = arith.constant 0 : index
      %36 = arith.index_cast %4 : i32 to index
      %37 = vector.load %arg4[%c0_16, %36] : memref<36x1536xf32, #tpu.memory_space<vmem>>, vector<36x512xf32>
      tpu.vector_store %arg4[%c0_16, %36], %35 {strides = array<i32>} : memref<36x1536xf32, #tpu.memory_space<vmem>>, vector<36x512xf32>,
    }
    %c3_i32_0 = arith.constant 3 : i32
    return
  }
  func.func @transform_0(%arg0: i32) -> (i32, i32) {
    %c0_i32 = arith.constant 0 : i32
    %c0_i32_0 = arith.constant 0 : i32
    return %c0_i32, %arg0 : i32, i32
  }
  func.func @transform_1(%arg0: i32) -> (i32, i32) {
    %c0_i32 = arith.constant 0 : i32
    %c0_i32_0 = arith.constant 0 : i32
    return %c0_i32, %arg0 : i32, i32
  }
  func.func @transform_2(%arg0: i32) -> (i32, i32, i32) {
    %c0_i32 = arith.constant 0 : i32
    %c0_i32_0 = arith.constant 0 : i32
    %c0_i32_1 = arith.constant 0 : i32
    %c0_i32_2 = arith.constant 0 : i32
    return %c0_i32, %c0_i32_0, %c0_i32_1 : i32, i32, i32
  }
  func.func @transform_3(%arg0: i32) -> (i32, i32) {
    %c0_i32 = arith.constant 0 : i32
    %c0_i32_0 = arith.constant 0 : i32
    return %c0_i32, %arg0 : i32, i32
  }
}

</mosaic_0001>

<bundles_post_ra>
// kernel: tpu_custom_call.1
= control target key start
LH: loop header
LB: loop body
LE: loop exit
PB: predicated region body
PF: predicated region fallthrough
CT: control target
= control target key end

     0   :  { %8 = vsyncpa [#allocation3], 0  ;;  %s2349_s0 = inlined_call_operand.hbm [shape: f32[12,3000], index: 0, kind: input, shape index: {}]   ;;  %s2350_s1 = inlined_call_operand.vmem [shape: f32[4,3000], index: 1, kind: input, shape index: {}]   ;;  %s2351_s2 = inlined_call_operand.vmem [shape: f32[4,36,12], index: 2, kind: input, shape index: {}]   ;;  %s2352_s3 = inlined_call_operand.hbm [shape: f32[36,3000], index: 3, kind: output, shape index: {}]  }
   0x1   :  { %10 = vsyncpa [#allocation3 + $0x1], 0 }
   0x2   :  { %11 = vsyncpa [#allocation4], 0 }
   0x3   :  { %13 = vsyncpa [#allocation4 + $0x1], 0  ;;  %s1874_s12 = smov 0   ;;  %s1876_s13 = smov 0  }
   0x4   :  { %s1878_s14 = smov 0   ;;  %s1880_s15 = smov 0  }
   0x5 LB: > { %s1895_s16 = sadd.s32 4294967295, %s1838_s15   ;;  %s1479_s17 = sadd.s32 4294967294, %s1838_s15   ;;  %s1838_s15 = sphi %s1880_s15, %s2367_s15   ;;  %s1834_s14 = sphi %s1878_s14, %s2366_s14   ;;  %s1830_s13 = sphi %s1876_s13, %s2365_s13   ;;  %s1826_s12 = sphi %s1874_s12, %s2364_s12  }
   0x6   : > { %s1899_s18 = sadd.s32 1, %s1838_s15   ;;  %s26_s19 = sadd.s32 1, %s1834_s14 }
   0x7   : > { %s23_s20 = ssub.s32 %s1838_s15, %s1899_s18  ;;  %p33_p0 = scmp.ne.s32.totalorder %s1834_s14, %s1830_s13 }
   0x8   : > { %p24_p1 = scmp.eq.s32.totalorder %s23_s20, 0  ;;  %p34_p2 = scmp.eq.s32.totalorder %s1838_s15, 0 }
   0x9   : > { %p39_p3 = scmp.ne.s32.totalorder %s1830_s13, %s1826_s12  ;;  %p40_p4 = scmp.eq.s32.totalorder %s1895_s16, 0 }
   0xa   : > { %s1911_s21 = scalar_select %p24_p1, %s1834_s14, %s26_s19  }
   0xb   : > { %p35_p5 = por %p34_p2, %p33_p0  ;;  %p1913_p6 = por %p40_p4, %p39_p3 }
   0xc   : > { %p110_p7 = scmp.eq.s32.totalorder %s1895_s16, 1  ;;  %p116_p8 = scmp.eq.s32.totalorder %s1479_s17, 1 }
   0xd   : > { %p1688_p10 = scmp.lt.s32.totalorder %s1838_s15, 2  ;;  %s139_s25 = sand.u32 1, %s1834_s14  }
   0xe   : > { %p1920_p11 = por %p110_p7, %p33_p0  ;;  %p1924_p12 = por %p116_p8, %p39_p3 }
   0xf   : > { %s1563_s26 = smul.u32 1536, %s1838_s15  ;;  %p1935_p13 = pnand %p1688_p10, %p35_p5 }
  0x10   : > { %s2355_s23 = scalar_select %p1920_p11, 1, 0 }
  0x11   : > { %s2356_s24 = scalar_select %p1924_p12, 1, 0 }
  0x12   : > { %s1673_s27 = smul.u32 192, %s139_s25  ;;  %s1933_s30 = scalar_lea.hbm %s2349_s0, %s1563_s26 }
  0x13   : > { %s1942_s7 = scalar_lea.sflag [#allocation3], %s139_s25  ;;  %s1738_s8 = scalar_lea.hbm %s1933_s30, 3072 }
  0x14   : > { %s143_s5 = scalar_lea.vmem [#allocation2], %s1673_s27  ;;  %p1739_p1 = scmp.ne.s32.totalorder %s1933_s30, %s1738_s8 }
  0x15   : > { %s150_s6 = sshll.u32 %s143_s5, 4  ;;  %p1740_p2 = pneg %p1935_p13  ;;  %s1939_s6 = int_to_ptr.vmem [resolvable:$true] %s150_s6 }
  0x16   : > { %s1743_s11 = scalar_lea.hbm %s2349_s0, 6144  ;;  %p1744_p5 = scmp.lt.u32.totalorder %s1933_s30, %s2349_s0 }
  0x17   : > { %p1741_p3 = pnand %p1740_p2, %p1739_p1  ;;  %p1745_p7 = scmp.lt.u32.totalorder %s1743_s11, %s1738_s8 }
  0x18   : > { %p1747_p10 = scmp.lt.u32.totalorder %s1738_s8, %s1933_s30 }
  0x19   : > { %p1742_p4 = pneg %p1741_p3  ;;  %p1746_p8 = por %p1745_p7, %p1744_p5 }
  0x1b   : > { %p1748_p9 = por %p1747_p10, %p1746_p8 }
  0x1d   : > { %p1749_p0 = pnand %p1748_p9, %p1742_p4 }
  0x1f   : > { %1752 = shalt.err (!%p1749_p0)
}
  0x20   : > { %s1753_s20 = scalar_lea.vmem %s1939_s6, 3072  ;;  %s1844_s25 = smov [#allocation2]  }
  0x21   : > { %p1754_p1 = scmp.ne.s32.totalorder %s1939_s6, %s1753_s20  ;;  %s1758_s26 = sshll.u32 %s1844_s25, 4  ;;  %s1759_s26 = int_to_ptr.vmem [resolvable:$false] %s1758_s26 }
  0x22   : > { %s1760_s27 = scalar_lea.vmem %s1759_s26, 6144  ;;  %p1761_p11 = scmp.lt.s32.totalorder %s1939_s6, %s1759_s26 }
  0x23   : > { %p1756_p3 = pnand %p1754_p1, %p1740_p2  ;;  %p1762_p5 = scmp.lt.s32.totalorder %s1760_s27, %s1753_s20 }
  0x25   : > { %p1757_p12 = pneg %p1756_p3  ;;  %p1763_p7 = por %p1762_p5, %p1761_p11 }
  0x27   : > { %p1764_p8 = pnand %p1763_p7, %p1757_p12 }
  0x29   : > { %1767 = shalt.err (!%p1764_p8)
}
  0x2a   : > { %s1845_s28 = smov 3072   ;;  %s1846_s29 = smov 1536  }
  0x2b   : > { %s1847_s5 = smov 96   ;;  %p167_p9 = scmp.lt.s32.totalorder %s1838_s15, 3 }
  0x2c   : > { %1683 = dma.hbm_to_vmem [thread:$0]  (!%p1935_p13), %s1933_s30, 3072, %s1939_s6, %s1942_s7, %s1845_s28, %s1846_s29, %s1847_s5  }
  0x2d   : > { %p2358_p0 = scmp.ge.s32.totalorder %s1838_s15, 1 }
  0x2f   : > { %p168_p2 = pnand %p2358_p0, %p167_p9 }
  0x30   : > { %s1974_s8 = sand.u32 (!%p168_p2), 1, %s1830_s13  }
  0x31   : > { %171 = sbr.rel (%p168_p2) target bundleno = 389 (0x185), region = 32  ;;  %s174_s10 = scalar_lea.sflag (!%p168_p2), [#allocation3], %s1974_s8 }
  0x32   : > { %s1674_s9 = smul.u32 (!%p168_p2), 192, %s1974_s8 }
  0x34   : > { %s1978_s11 = scalar_lea.vmem (!%p168_p2), [#allocation2], %s1674_s9 }
  0x38   : > { %1817 = dma.done.wait (%p1913_p6), %s174_s10, 3072  }
  0x39   : > { %1819 = vsyncadd (%p1913_p6), %s174_s10, 4294964224  ;;  %s1675_s30 = smul.u32 480, %s1974_s8  ;;  %s1993_s25 = smov 0  }
  0x3a   : > { %s206_s4 = smul.u32 12, %s1895_s16 }
  0x3b   : > { %s1991_s20 = scalar_lea.vmem [#allocation5], %s1675_s30 }
  0x3c   : > { %p207_p11 = scmp.lt.s32.totalorder %s206_s4, 23 }
  0x3e   : > { %s2369_s4 = smov (!%p207_p11, %s206_s4), 23 }
  0x3f   : > { %s1484_s6 = sshll.u32 %s2369_s4, 2 }
  0x40   : > { %s1989_s19 = scalar_lea.vmem %s2350_s1, %s1484_s6 }
  0x41 LB: >> { %v243_v0 = vlaneseq  ;;  %v1848_v1 = vmov 0.0   ;;  %s1485_s22 = sshll.u32 %s1842_s25, 9  ;;  %vm353_vm0 = vcmask 1043456   ;;  %vm1849_vm1 = vmmov 1   ;;  %v1488_v56 = vld [vmem:[%s2351_s2 + $0x28] sm:$0xff]  ;;  %s218_s25 = sadd.s32 1, %s1842_s25   ;;  %s1842_s25 = sphi %s1993_s25, %s218_s25  }
  0x42   : >> { %430 = vmatprep.mubr.f32.mxu0 %v1848_v1  ;;  %525 = vmatprep.mubr.f32.mxu1 %v1848_v1  ;;  %s2003_s26 = sshra.s32 %s1485_s22, 7  ;;  %vm2052_vm2 = vmpackc.low %vm353_vm0, %vm1849_vm1  ;;  %vm337_vm3 = vcmask 97280   ;;  %v1525_v39 = vld [vmem:[%s2351_s2 + $0x70] sm:$0xf]  ;;  %p215_p6 = scmp.ge.s32.totalorder %s218_s25, 3  }
  0x43   : >> { %v2001_v2 = vshrl.u32 %v243_v0, 7  ;;  %s1486_s27 = sshll.u32 %s2003_s26, 3  ;;  %s1487_s28 = sshll.u32 %s2003_s26, 2 }
  0x44   : >> { %s223_s29 = scalar_lea.vmem %s1978_s11, %s1486_s27 [#allocation2]  ;;  %s233_s5 = scalar_lea.vmem %s1989_s19, %s1487_s28 }
  0x45   : >> { %v295_v3 = vsub.s32 1, %v2001_v2  ;;  %v299_v4 = vsub.s32 5, %v2001_v2  ;;  %v245_v5 = vsub.s32 0, %v2001_v2  ;;  %v249_v6 = vsub.s32 4, %v2001_v2  ;;  %v2015_v7 = vld [vmem:[%s233_s5] sm:$0xff]  ;;  %v2021_v10 = vld [vmem:[%s223_s29 + $0x8] sm:$0xff]  ;;  %s2273_s22 = scalar_lea.vmem %s1991_s20, %s1486_s27 [#allocation5] }
  0x46   : >> { %v2018_v8 = vsub.s32 2, %v2001_v2  ;;  %v785_v9 = vsub.s32 6, %v2001_v2  ;;  %v2023_v11 = vld [vmem:[%s223_s29 + $0x68] sm:$0xf]  ;;  %v2031_v17 = vld [vmem:[%s223_s29 + $0x18] sm:$0xff]  ;;  %v2034_v19 = vld [vmem:[%s223_s29] sm:$0xff] }
  0x47   : >> { %v300_v12 = vrot.slane %v2015_v7, %v299_v4  ;;  %v2026_v13 = vld [vmem:[%s233_s5 + $0x8] sm:$0xff]  ;;  %v296_v14 = vrot.slane %v2015_v7, %v295_v3  ;;  %v250_v15 = vrot.slane %v2015_v7, %v249_v6  ;;  %v246_v16 = vrot.slane %v2015_v7, %v245_v5  ;;  %v2036_v20 = vld [vmem:[%s223_s29 + $0x60] sm:$0xf]  ;;  %v2041_v25 = vld [vmem:[%s223_s29 + $0x78] sm:$0xf]  ;;  %s1564_s26 = smul.u32 (%p215_p6), 1536, %s1895_s16 }
  0x48   : >> { %v308_v18 = vrot.slane %v2026_v13, %v299_v4  ;;  %v304_v21 = vrot.slane %v2026_v13, %v295_v3  ;;  %v258_v22 = vrot.slane %v2026_v13, %v249_v6  ;;  %v254_v23 = vrot.slane %v2026_v13, %v245_v5  ;;  %v2043_v27 = vld [vmem:[%s223_s29 + $0x10] sm:$0xff]  ;;  %s1383_s27 = sshll.u32 (%p215_p6), %s1991_s20, 4  ;;  %s1370_s9 = scalar_lea.sflag (%p215_p6), [#allocation4], %s1974_s8  ;;  %s2305_s27 = int_to_ptr.vmem [resolvable:$true] %s1383_s27 }
  0x49   : >> { %v320_v24 = vrot.slane %v300_v12, %v295_v3  ;;  %v316_v26 = vrot.slane %v296_v14, %v295_v3  ;;  %v2045_v28 = vld [vmem:[%s223_s29 + $0x70] sm:$0xf]  ;;  %v270_v29 = vrot.slane %v250_v15, %v245_v5  ;;  %v266_v30 = vrot.slane %v246_v16, %v245_v5  ;;  %v1490_v16 = vld [vmem:[%s2351_s2 + $0x38] sm:$0xff]  ;;  %s2303_s5 = scalar_lea.hbm (%p215_p6), %s2352_s3, %s1564_s26  ;;  %s1768_s10 = scalar_lea.vmem (%p215_p6), %s2305_s27, 7680 }
  0x4a   : >> { %v328_v31 = vrot.slane %v308_v18, %v295_v3  ;;  %v324_v32 = vrot.slane %v304_v21, %v295_v3  ;;  %v278_v33 = vrot.slane %v258_v22, %v245_v5  ;;  %v274_v34 = vrot.slane %v254_v23, %v245_v5  ;;  %v1489_v3 = vld [vmem:[%s2351_s2 + $0x30] sm:$0xff]  ;;  %p1769_p12 = scmp.ne.s32.totalorder (%p215_p6), %s2305_s27, %s1768_s10  ;;  %p2361_p13 = scmp.ne.s32.totalorder (%p215_p6), %s2355_s23, 0 }
  0x4b   : >> { %v330_v35 = vmul.f32 %v320_v24, %v2021_v10  ;;  %v334_v36 = vmul.f32 %v320_v24, %v2023_v11  ;;  %v329_v37 = vmul.f32 %v316_v26, %v2034_v19  ;;  %v333_v38 = vmul.f32 %v316_v26, %v2036_v20  ;;  %v1491_v26 = vld [vmem:[%s2351_s2 + $0x40] sm:$0xff]  ;;  %s1850_s11 = smov (%p215_p6), [#allocation5]  }
  0x4c   : >> { %v332_v40 = vmul.f32 %v328_v31, %v2031_v17  ;;  %v336_v41 = vmul.f32 %v328_v31, %v2041_v25  ;;  %v331_v42 = vmul.f32 %v324_v32, %v2043_v27  ;;  %v335_v43 = vmul.f32 %v324_v32, %v2045_v28  ;;  %v1492_v32 = vld [vmem:[%s2351_s2 + $0x48] sm:$0xf]  ;;  %p1770_p4 = pnand (%p215_p6), %p1769_p12, %p2361_p13  ;;  %s1772_s19 = sshll.u32 (%p215_p6), %s1850_s11, 4  ;;  %s1773_s19 = int_to_ptr.vmem [resolvable:$false] %s1772_s19 }
  0x4d   : >> { %v1565_v44 = vpack.c.bf16 %v334_v36, %v330_v35  ;;  %v1568_v45 = vpack.c.bf16 %v333_v38, %v329_v37  ;;  %v280_v46 = vmul.f32 %v270_v29, %v2021_v10  ;;  %v284_v47 = vmul.f32 %v270_v29, %v2023_v11  ;;  %s1774_s16 = scalar_lea.vmem (%p215_p6), %s1773_s19, 15360  ;;  %p1775_p1 = scmp.lt.s32.totalorder (%p215_p6), %s2305_s27, %s1773_s19 }
  0x4e   : >> { %v1571_v48 = vpack.c.bf16 %v336_v41, %v332_v40  ;;  %v1574_v49 = vpack.c.bf16 %v335_v43, %v331_v42  ;;  %v282_v50 = vmul.f32 %v278_v33, %v2031_v17  ;;  %v286_v51 = vmul.f32 %v278_v33, %v2041_v25  ;;  %v236_v41 = vld [vmem:[%s2351_s2] sm:$0xff]  ;;  %p1771_p10 = pneg (%p215_p6), %p1770_p4  ;;  %p1776_p3 = scmp.lt.s32.totalorder (%p215_p6), %s1774_s16, %s1768_s10 }
  0x4f   : >> { %1567 = vmatprep.subr.msk.bf16.mxu0 %vm2052_vm2, %v1565_v44  ;;  %v1577_v52 = vpack.c.bf16 %v284_v47, %v280_v46  ;;  %v279_v53 = vmul.f32 %v266_v30, %v2034_v19  ;;  %v283_v54 = vmul.f32 %v266_v30, %v2036_v20  ;;  %v281_v55 = vmul.f32 %v274_v34, %v2043_v27  ;;  %v239_v46 = vld [vmem:[%s2351_s2 + $0x18] sm:$0xff] }
  0x50   : >> { %1573 = vmatprep.subr.msk.bf16.mxu1 %vm2052_vm2, %v1571_v48  ;;  %1570 = vmatpush1.bf16.msk.msra.mxu0 %vm2052_vm2, %v1568_v45  ;;  %v1583_v57 = vpack.c.bf16 %v286_v51, %v282_v50  ;;  %v285_v58 = vmul.f32 %v274_v34, %v2045_v28  ;;  %v786_v59 = vrot.slane %v2015_v7, %v785_v9  ;;  %v1072_v14 = vsub.s32 7, %v2001_v2  ;;  %p1777_p5 = por (%p215_p6), %p1776_p3, %p1775_p1 }
  0x51   : >> { %1576 = vmatpush1.bf16.msk.msra.mxu1 %vm2052_vm2, %v1574_v49  ;;  %1579 = vmatprep.subr.msk.bf16.mxu0 %vm2052_vm2, %v1577_v52  ;;  %v1580_v60 = vpack.c.bf16 %v283_v54, %v279_v53  ;;  %v794_v61 = vrot.slane %v2026_v13, %v785_v9  ;;  %v782_v18 = vrot.slane %v2015_v7, %v2018_v8  ;;  %v1068_v22 = vsub.s32 3, %v2001_v2  ;;  %v1521_v52 = vld [vmem:[%s2351_s2 + $0x50] sm:$0xff]  ;;  %v1540_v54 = vld [vmem:[%s2351_s2 + $0x78] sm:$0xff] }
  0x52   : >> { %1585 = vmatprep.subr.msk.bf16.mxu1 %vm2052_vm2, %v1583_v57  ;;  %v1586_v62 = vpack.c.bf16 %v285_v58, %v281_v55  ;;  %v806_v63 = vrot.slane %v786_v59, %v2018_v8  ;;  %v790_v21 = vrot.slane %v2026_v13, %v2018_v8  ;;  %v1073_v23 = vrot.slane %v2015_v7, %v1072_v14  ;;  %v1541_v55 = vld [vmem:[%s2351_s2 + $0x80] sm:$0xff]  ;;  %v1543_v57 = vld [vmem:[%s2351_s2 + $0x90] sm:$0xff]  ;;  %v1544_v58 = vld [vmem:[%s2351_s2 + $0x98] sm:$0xf]  ;;  %p1778_p7 = pnand (%p215_p6), %p1777_p5, %p1771_p10 }
  0x53   : >> { %1495 = vmatmul.mubr.msk.f32.vlgmr.msra.gmra.mrb[0].mxu0 %vm337_vm3, %v1488_v56  ;;  %v814_v0 = vrot.slane %v794_v61, %v2018_v8  ;;  %v1081_v24 = vrot.slane %v2026_v13, %v1072_v14  ;;  %v802_v29 = vrot.slane %v782_v18, %v2018_v8  ;;  %v1069_v44 = vrot.slane %v2015_v7, %v1068_v22  ;;  %v240_v7 = vld [vmem:[%s2351_s2 + $0x20] sm:$0xf] }
  0x54   : >> { %1502 = vmatmul.mubr.msk.f32.vlgmr.msra.gmra.mrb[0].mxu1 %vm337_vm3, %v1488_v56  ;;  %1582 = vmatpush1.bf16.msk.msra.mxu0 %vm2052_vm2, %v1580_v60  ;;  %v816_v4 = vmul.f32 %v806_v63, %v2021_v10  ;;  %v820_v5 = vmul.f32 %v806_v63, %v2023_v11  ;;  %v810_v2 = vrot.slane %v790_v21, %v2018_v8  ;;  %v1542_v56 = vld [vmem:[%s2351_s2 + $0x88] sm:$0xff] }
  0x55   : >> { %1588 = vmatpush1.bf16.msk.msra.mxu1 %vm2052_vm2, %v1586_v62  ;;  %436 = vmatprep.mubr.f32.mxu0 %v1848_v1  ;;  %v818_v6 = vmul.f32 %v814_v0, %v2031_v17  ;;  %v822_v9 = vmul.f32 %v814_v0, %v2041_v25  ;;  %v1093_v30 = vrot.slane %v1073_v23, %v1068_v22 }
  0x56   : >> { %531 = vmatprep.mubr.f32.mxu1 %v1848_v1  ;;  %v1589_v12 = vpack.c.bf16 %v820_v5, %v816_v4  ;;  %v1101_v31 = vrot.slane %v1081_v24, %v1068_v22  ;;  %v815_v33 = vmul.f32 %v802_v29, %v2034_v19  ;;  %v819_v34 = vmul.f32 %v802_v29, %v2036_v20 }
  0x57   : >> { %1496 = vmatmul.mubr.msk.f32.gmra.mrb[2].mxu0 %vm337_vm3, %v1489_v3  ;;  %v1595_v15 = vpack.c.bf16 %v822_v9, %v818_v6  ;;  %v817_v8 = vmul.f32 %v810_v2, %v2043_v27  ;;  %v821_v35 = vmul.f32 %v810_v2, %v2045_v28  ;;  %v1103_v36 = vmul.f32 %v1093_v30, %v2021_v10 }
  0x58   : >> { %1503 = vmatmul.mubr.msk.f32.gmra.mrb[2].mxu1 %vm337_vm3, %v1489_v3  ;;  %442 = vmatprep.mubr.f32.mxu0 %v1848_v1  ;;  %v1107_v37 = vmul.f32 %v1093_v30, %v2023_v11  ;;  %v1105_v38 = vmul.f32 %v1101_v31, %v2031_v17  ;;  %v1109_v40 = vmul.f32 %v1101_v31, %v2041_v25  ;;  %v237_v17 = vld [vmem:[%s2351_s2 + $0x8] sm:$0xff]  ;;  %v238_v25 = vld [vmem:[%s2351_s2 + $0x10] sm:$0xff] }
  0x59   : >> { %537 = vmatprep.mubr.f32.mxu1 %v1848_v1  ;;  %1591 = vmatprep.subr.msk.bf16.mxu0 %vm2052_vm2, %v1589_v12  ;;  %v1592_v42 = vpack.c.bf16 %v819_v34, %v815_v33  ;;  %v1598_v10 = vpack.c.bf16 %v821_v35, %v817_v8  ;;  %v1077_v45 = vrot.slane %v2026_v13, %v1068_v22 }
  0x5a   : >> { %1597 = vmatprep.subr.msk.bf16.mxu1 %vm2052_vm2, %v1595_v15  ;;  %v1601_v43 = vpack.c.bf16 %v1107_v37, %v1103_v36  ;;  %v1607_v11 = vpack.c.bf16 %v1109_v40, %v1105_v38  ;;  %v1089_v47 = vrot.slane %v1069_v44, %v1068_v22 }
  0x5b   : >> { %1497 = vmatmul.mubr.msk.f32.gmra.mrb[4].mxu0 %vm337_vm3, %v1490_v16  ;;  %v1097_v48 = vrot.slane %v1077_v45, %v1068_v22 }
  0x5c   : >> { %1504 = vmatmul.mubr.msk.f32.gmra.mrb[4].mxu1 %vm337_vm3, %v1490_v16  ;;  %448 = vmatprep.mubr.f32.mxu0 %v1848_v1  ;;  %v1102_v13 = vmul.f32 %v1089_v47, %v2034_v19  ;;  %v1106_v49 = vmul.f32 %v1089_v47, %v2036_v20  ;;  %v1522_v20 = vld [vmem:[%s2351_s2 + $0x58] sm:$0xff] }
  0x5d   : >> { %543 = vmatprep.mubr.f32.mxu1 %v1848_v1  ;;  %v1104_v50 = vmul.f32 %v1097_v48, %v2043_v27  ;;  %v1108_v51 = vmul.f32 %v1097_v48, %v2045_v28  ;;  %v1523_v27 = vld [vmem:[%s2351_s2 + $0x60] sm:$0xff]  ;;  %v1524_v28 = vld [vmem:[%s2351_s2 + $0x68] sm:$0xff] }
  0x5e   : >> { %v1604_v53 = vpack.c.bf16 %v1106_v49, %v1102_v13 }
  0x5f   : >> { %1498 = vmatmul.mubr.msk.f32.gmra.mrb[6].mxu0 %vm337_vm3, %v1491_v26  ;;  %v1610_v19 = vpack.c.bf16 %v1108_v51, %v1104_v50 }
  0x60   : >> { %1505 = vmatmul.mubr.msk.f32.gmra.mrb[6].mxu1 %vm337_vm3, %v1491_v26  ;;  %454 = vmatprep.mubr.f32.mxu0 %v1848_v1 }
  0x61   : >> { %549 = vmatprep.mubr.f32.mxu1 %v1848_v1 }
  0x63   : >> { %1499 = vmatmul.mubr.msk.f32.gmra.mrb[8].mxu0 %vm337_vm3, %v1492_v32 }
  0x64   : >> { %1506 = vmatmul.mubr.msk.f32.gmra.mrb[8].mxu1 %vm337_vm3, %v1492_v32  ;;  %647 = vmatprep.mubr.f32.mxu0 %v1848_v1 }
  0x65   : >> { %742 = vmatprep.mubr.f32.mxu1 %v1848_v1 }
  0x67   : >> { %1509 = vmatmul.mubr.msk.f32.vlgmr.msra.gmra.mrb[0].mxu0 %vm337_vm3, %v236_v41 }
  0x68   : >> { %1516 = vmatmul.mubr.msk.f32.vlgmr.msra.gmra.mrb[0].mxu1 %vm337_vm3, %v236_v41  ;;  %1594 = vmatpush1.bf16.msk.msra.mxu0 %vm2052_vm2, %v1592_v42 }
  0x69   : >> { %1600 = vmatpush1.bf16.msk.msra.mxu1 %vm2052_vm2, %v1598_v10  ;;  %653 = vmatprep.mubr.f32.mxu0 %v1848_v1 }
  0x6a   : >> { %748 = vmatprep.mubr.f32.mxu1 %v1848_v1  ;;  %1603 = vmatprep.subr.msk.bf16.mxu0 %vm2052_vm2, %v1601_v43 }
  0x6b   : >> { %1510 = vmatmul.mubr.msk.f32.gmra.mrb[2].mxu0 %vm337_vm3, %v237_v17  ;;  %1609 = vmatprep.subr.msk.bf16.mxu1 %vm2052_vm2, %v1607_v11 }
  0x6c   : >> { %1517 = vmatmul.mubr.msk.f32.gmra.mrb[2].mxu1 %vm337_vm3, %v237_v17  ;;  %659 = vmatprep.mubr.f32.mxu0 %v1848_v1 }
  0x6d   : >> { %754 = vmatprep.mubr.f32.mxu1 %v1848_v1 }
  0x6f   : >> { %1511 = vmatmul.mubr.msk.f32.gmra.mrb[4].mxu0 %vm337_vm3, %v238_v25 }
  0x70   : >> { %1518 = vmatmul.mubr.msk.f32.gmra.mrb[4].mxu1 %vm337_vm3, %v238_v25  ;;  %665 = vmatprep.mubr.f32.mxu0 %v1848_v1 }
  0x71   : >> { %760 = vmatprep.mubr.f32.mxu1 %v1848_v1 }
  0x73   : >> { %1512 = vmatmul.mubr.msk.f32.gmra.mrb[6].mxu0 %vm337_vm3, %v239_v46 }
  0x74   : >> { %1519 = vmatmul.mubr.msk.f32.gmra.mrb[6].mxu1 %vm337_vm3, %v239_v46  ;;  %671 = vmatprep.mubr.f32.mxu0 %v1848_v1 }
  0x75   : >> { %766 = vmatprep.mubr.f32.mxu1 %v1848_v1 }
  0x77   : >> { %1513 = vmatmul.mubr.msk.f32.gmra.mrb[8].mxu0 %vm337_vm3, %v240_v7 }
  0x78   : >> { %1520 = vmatmul.mubr.msk.f32.gmra.mrb[8].mxu1 %vm337_vm3, %v240_v7  ;;  %914 = vmatprep.mubr.f32.mxu0 %v1848_v1 }
  0x79   : >> { %1009 = vmatprep.mubr.f32.mxu1 %v1848_v1 }
  0x7b   : >> { %1528 = vmatmul.mubr.msk.f32.vlgmr.msra.gmra.mrb[0].mxu0 %vm337_vm3, %v1521_v52 }
  0x7c   : >> { %1535 = vmatmul.mubr.msk.f32.vlgmr.msra.gmra.mrb[0].mxu1 %vm337_vm3, %v1521_v52  ;;  %1606 = vmatpush1.bf16.msk.msra.mxu0 %vm2052_vm2, %v1604_v53 }
  0x7d   : >> { %1612 = vmatpush1.bf16.msk.msra.mxu1 %vm2052_vm2, %v1610_v19  ;;  %920 = vmatprep.mubr.f32.mxu0 %v1848_v1 }
  0x7e   : >> { %1015 = vmatprep.mubr.f32.mxu1 %v1848_v1 }
  0x7f   : >> { %1529 = vmatmul.mubr.msk.f32.gmra.mrb[2].mxu0 %vm337_vm3, %v1522_v20 }
  0x80   : >> { %1536 = vmatmul.mubr.msk.f32.gmra.mrb[2].mxu1 %vm337_vm3, %v1522_v20  ;;  %926 = vmatprep.mubr.f32.mxu0 %v1848_v1 }
  0x81   : >> { %1021 = vmatprep.mubr.f32.mxu1 %v1848_v1 }
  0x83   : >> { %1530 = vmatmul.mubr.msk.f32.gmra.mrb[4].mxu0 %vm337_vm3, %v1523_v27 }
  0x84   : >> { %1537 = vmatmul.mubr.msk.f32.gmra.mrb[4].mxu1 %vm337_vm3, %v1523_v27  ;;  %932 = vmatprep.mubr.f32.mxu0 %v1848_v1 }
  0x85   : >> { %1027 = vmatprep.mubr.f32.mxu1 %v1848_v1 }
  0x87   : >> { %1531 = vmatmul.mubr.msk.f32.gmra.mrb[6].mxu0 %vm337_vm3, %v1524_v28 }
  0x88   : >> { %1538 = vmatmul.mubr.msk.f32.gmra.mrb[6].mxu1 %vm337_vm3, %v1524_v28  ;;  %938 = vmatprep.mubr.f32.mxu0 %v1848_v1 }
  0x89   : >> { %1033 = vmatprep.mubr.f32.mxu1 %v1848_v1 }
  0x8b   : >> { %1532 = vmatmul.mubr.msk.f32.gmra.mrb[8].mxu0 %vm337_vm3, %v1525_v39 }
  0x8c   : >> { %1539 = vmatmul.mubr.msk.f32.gmra.mrb[8].mxu1 %vm337_vm3, %v1525_v39  ;;  %1201 = vmatprep.mubr.f32.mxu0 %v1848_v1 }
  0x8d   : >> { %1296 = vmatprep.mubr.f32.mxu1 %v1848_v1 }
  0x8f   : >> { %1547 = vmatmul.mubr.msk.f32.vlgmr.msra.gmra.mrb[0].mxu0 %vm337_vm3, %v1540_v54 }
  0x90   : >> { %1554 = vmatmul.mubr.msk.f32.vlgmr.msra.gmra.mrb[0].mxu1 %vm337_vm3, %v1540_v54  ;;  %1207 = vmatprep.mubr.f32.mxu0 %v1848_v1 }
  0x91   : >> { %1302 = vmatprep.mubr.f32.mxu1 %v1848_v1 }
  0x93   : >> { %1548 = vmatmul.mubr.msk.f32.gmra.mrb[2].mxu0 %vm337_vm3, %v1541_v55 }
  0x94   : >> { %1555 = vmatmul.mubr.msk.f32.gmra.mrb[2].mxu1 %vm337_vm3, %v1541_v55  ;;  %1213 = vmatprep.mubr.f32.mxu0 %v1848_v1 }
  0x95   : >> { %1308 = vmatprep.mubr.f32.mxu1 %v1848_v1 }
  0x97   : >> { %1549 = vmatmul.mubr.msk.f32.gmra.mrb[4].mxu0 %vm337_vm3, %v1542_v56 }
  0x98   : >> { %1556 = vmatmul.mubr.msk.f32.gmra.mrb[4].mxu1 %vm337_vm3, %v1542_v56  ;;  %1219 = vmatprep.mubr.f32.mxu0 %v1848_v1 }
  0x99   : >> { %1314 = vmatprep.mubr.f32.mxu1 %v1848_v1 }
  0x9b   : >> { %1550 = vmatmul.mubr.msk.f32.gmra.mrb[6].mxu0 %vm337_vm3, %v1543_v57 }
  0x9c   : >> { %1557 = vmatmul.mubr.msk.f32.gmra.mrb[6].mxu1 %vm337_vm3, %v1543_v57  ;;  %1225 = vmatprep.mubr.f32.mxu0 %v1848_v1 }
  0x9d   : >> { %1320 = vmatprep.mubr.f32.mxu1 %v1848_v1 }
  0x9f   : >> { %1551 = vmatmul.mubr.msk.f32.gmra.mrb[8].mxu0 %vm337_vm3, %v1544_v58 }
  0xa0   : >> { %1558 = vmatmul.mubr.msk.f32.gmra.mrb[8].mxu1 %vm337_vm3, %v1544_v58 }
 0x162   : >> { %v1203_v59 = vpop.f32.mrb[0].mxu0 }
 0x163   : >> { %1349 = vst [vmem:[%s2273_s22] sm:$0xff] %v1203_v59  ;;  %v1298_v60 = vpop.f32.mrb[0].mxu1  ;;  %v1205_v1 = vpop.f32.mrb[1].mxu0 }
 0x164   : >> { %1351 = vst [vmem:[%s2273_s22 + $0x10] sm:$0xff] %v1298_v60  ;;  %1350 = vst [vmem:[%s2273_s22 + $0x8] sm:$0xff] %v1205_v1  ;;  %v1300_v61 = vpop.f32.mrb[1].mxu1 }
 0x165   : >> { %1352 = vst [vmem:[%s2273_s22 + $0x18] sm:$0xff] %v1300_v61 }
 0x166   : >> { %v1209_v62 = vpop.f32.mrb[2].mxu0 }
 0x167   : >> { %1353 = vst [vmem:[%s2273_s22 + $0x60] sm:$0xff] %v1209_v62  ;;  %v1304_v63 = vpop.f32.mrb[2].mxu1  ;;  %v1211_v0 = vpop.f32.mrb[3].mxu0 }
 0x168   : >> { %1355 = vst [vmem:[%s2273_s22 + $0x70] sm:$0xff] %v1304_v63  ;;  %1354 = vst [vmem:[%s2273_s22 + $0x68] sm:$0xff] %v1211_v0  ;;  %v1306_v3 = vpop.f32.mrb[3].mxu1 }
 0x169   : >> { %1356 = vst [vmem:[%s2273_s22 + $0x78] sm:$0xff] %v1306_v3 }
 0x16a   : >> { %v1215_v4 = vpop.f32.mrb[4].mxu0 }
 0x16b   : >> { %1357 = vst [vmem:[%s2273_s22 + $0xc0] sm:$0xff] %v1215_v4  ;;  %v1310_v5 = vpop.f32.mrb[4].mxu1  ;;  %v1217_v6 = vpop.f32.mrb[5].mxu0 }
 0x16c   : >> { %1359 = vst [vmem:[%s2273_s22 + $0xd0] sm:$0xff] %v1310_v5  ;;  %1358 = vst [vmem:[%s2273_s22 + $0xc8] sm:$0xff] %v1217_v6  ;;  %v1312_v9 = vpop.f32.mrb[5].mxu1 }
 0x16d   : >> { %1360 = vst [vmem:[%s2273_s22 + $0xd8] sm:$0xff] %v1312_v9 }
 0x16e   : >> { %v1221_v12 = vpop.f32.mrb[6].mxu0 }
 0x16f   : >> { %1361 = vst [vmem:[%s2273_s22 + $0x120] sm:$0xff] %v1221_v12  ;;  %v1316_v14 = vpop.f32.mrb[6].mxu1  ;;  %v1223_v15 = vpop.f32.mrb[7].mxu0  ;;  %217 = sbr.rel (!%p215_p6) target bundleno = 65 (0x41), region = 93 }
 0x170   : >> { %1363 = vst [vmem:[%s2273_s22 + $0x130] sm:$0xff] %v1316_v14  ;;  %1362 = vst [vmem:[%s2273_s22 + $0x128] sm:$0xff] %v1223_v15  ;;  %v1318_v16 = vpop.f32.mrb[7].mxu1 }
 0x171   : >> { %1364 = vst [vmem:[%s2273_s22 + $0x138] sm:$0xff] %v1318_v16 }
 0x172   : >> { %v1227_v18 = vpop.f32.mrb[8].mxu0 }
 0x173   : >> { %1365 = vst [vmem:[%s2273_s22 + $0x180] sm:$0xf] %v1227_v18  ;;  %v1322_v21 = vpop.f32.mrb[8].mxu1  ;;  %v1229_v22 = vpop.f32.mrb[9].mxu0 }
 0x174   : >> { %1367 = vst [vmem:[%s2273_s22 + $0x190] sm:$0xf] %v1322_v21  ;;  %1366 = vst [vmem:[%s2273_s22 + $0x188] sm:$0xf] %v1229_v22  ;;  %v1324_v23 = vpop.f32.mrb[9].mxu1 }
 0x175   : >> { %1368 = vst [vmem:[%s2273_s22 + $0x198] sm:$0xf] %v1324_v23 }
 0x176   : > { %1781 = shalt.err (!%p1778_p7)
}
 0x177   : > { %s1782_s20 = scalar_lea.hbm %s2303_s5, 7680  ;;  %s1786_s4 = scalar_lea.hbm %s2352_s3, 15360 }
 0x178   : > { %p1783_p8 = scmp.ne.s32.totalorder %s2303_s5, %s1782_s20  ;;  %p1787_p2 = scmp.lt.u32.totalorder %s2303_s5, %s2352_s3 }
 0x179   : > { %p1788_p11 = scmp.lt.u32.totalorder %s1786_s4, %s1782_s20  ;;  %p1790_p12 = scmp.lt.u32.totalorder %s1782_s20, %s2303_s5 }
 0x17a   : > { %p1784_p9 = pnand %p1783_p8, %p2361_p13 }
 0x17b   : > { %p1789_p6 = por %p1788_p11, %p1787_p2 }
 0x17c   : > { %p1785_p0 = pneg %p1784_p9 }
 0x17d   : > { %p1791_p4 = por %p1790_p12, %p1789_p6 }
 0x17f   : > { %p1792_p10 = pnand %p1791_p4, %p1785_p0 }
 0x181   : > { %1795 = shalt.err (!%p1792_p10)
}
 0x182   : > { %s1851_s17 = smov 1536   ;;  %s1852_s22 = smov 3072  }
 0x183   : > { %s1853_s26 = smov 96  }
 0x184   : > { %1678 = dma.vmem_to_hbm [thread:$0]  (%p2361_p13), %s2305_s27, 7680, %s2303_s5, %s1370_s9, %s1851_s17, %s1852_s22, %s1853_s26  }
 0x185 PF: > { %s1398_s28 = sand.u32 1, %s1826_s12   ;;  %p2362_p1 = scmp.ne.s32.totalorder %s2356_s24, 0 }
 0x186   : > { %p2363_p3 = scmp.ge.s32.totalorder %s1838_s15, 2  ;;  %s1399_s29 = scalar_lea.sflag [#allocation4], %s1398_s28 }
 0x188   : > { %p1685_p5 = pnand %p2363_p3, %p2362_p1 }
 0x18a   : > { %1821 = dma.done.wait (!%p1685_p5), %s1399_s29, 7680  }
 0x18b   : > { %1823 = vsyncadd (!%p1685_p5), %s1399_s29, 4294959616  ;;  %p16_p7 = scmp.ge.s32.totalorder %s1899_s18, 4   ;;  %s2364_s12 = smov %s1830_s13 }
 0x18c   : > { %s2365_s13 = smov %s1834_s14  ;;  %s2366_s14 = smov %s1911_s21 }
 0x18d   : > { %s2367_s15 = smov %s1899_s18  ;;  %18 = sbr.rel (!%p16_p7) target bundleno = 5 (0x5), region = 104 }
 0x194   :  { %1404 = vsyncpa [#allocation3], 1 }
 0x195   :  { %1406 = vsyncpa [#allocation3 + $0x1], 1 }
 0x196   :  { %1407 = vsyncpa [#allocation4], 1 }
 0x197   :  { %1409 = vsyncpa [#allocation4 + $0x1], 1 }

</bundles_post_ra>
